<compile_context>
chip_gen: v6e
topology: v6e:2x2x1
jax: 0.10.0
libtpu: 0.0.40
codegen_flags: <defaults>
</compile_context>

<pallas_src>
import math
import functools

import jax
import jax.numpy as jnp
from jax.experimental import pallas as pl
from jax.experimental.pallas import tpu as pltpu

MAX_INPUT_SEQUENCE_LENGTH = 5000

_GOLDEN = 0x9E3779B9


def build_positional_encoding(encoding_size: int, max_len: int) -> jnp.ndarray:
    """Replicates the buffer built in PositionalEncoding.__init__ (shape [1, max_len, D])."""
    positions = jnp.arange(0, max_len, dtype=jnp.float32)[:, None]             # [max_len, 1]
    num_in_exp = jnp.arange(0, encoding_size, 2, dtype=jnp.float32)            # [D/2]
    denominators = jnp.exp(num_in_exp * (-math.log(10000.0) / encoding_size))  # [D/2]
    angles = positions * denominators                                          # [max_len, D/2]
    pe = jnp.zeros((max_len, encoding_size), dtype=jnp.float32)
    pe = pe.at[:, 0::2].set(jnp.sin(angles))
    pe = pe.at[:, 1::2].set(jnp.cos(angles))
    return pe[None, :, :]                                                      # [1, max_len, D]


def _keep_mask(gidx_u32, seed_u32, dropout_prob: float):
    """Stateless per-element keep mask with probability (1 - p).

    splitmix32-style integer mix of (global element index, seed). Pure VPU
    elementwise ops: works on TPU and in interpret mode, and is independent of
    how the tensor is tiled. Threshold rounding bias is <= 2^-32 (negligible).
    """
    z = gidx_u32 + seed_u32 * jnp.uint32(_GOLDEN)
    z = z ^ (z >> 16)
    z = z * jnp.uint32(0x7FEB352D)
    z = z ^ (z >> 15)
    z = z * jnp.uint32(0x846CA68B)
    z = z ^ (z >> 16)
    threshold = jnp.uint32(min(int(round(dropout_prob * 2.0 ** 32)), 2 ** 32 - 1))
    return z >= threshold


def _pos_enc_kernel(seed_ref, x_ref, pe_ref, o_ref, *,
                    dropout_prob, training, n_per_batch, lanes, row_tile):
    # x_ref / pe_ref / o_ref: VMEM tiles of shape (1, row_tile, lanes).
    # Add in f32 (keeps v5e happy if activations are bf16; PE is streamed in x.dtype).
    y = x_ref[...].astype(jnp.float32) + pe_ref[...].astype(jnp.float32)

    if training and dropout_prob > 0.0:          # static Python branch: eval traces no PRNG code
        if dropout_prob >= 1.0:
            y = jnp.zeros_like(y)
        else:
            row_tile_idx = pl.program_id(0)
            b = pl.program_id(1)
            rows = jax.lax.broadcasted_iota(jnp.int32, y.shape, 1)
            cols = jax.lax.broadcasted_iota(jnp.int32, y.shape, 2)
            # Global element index == b*S*D + s*D + d, invariant to the lane-dense reshape.
            gidx = (b * n_per_batch
                    + (row_tile_idx * row_tile + rows) * lanes
                    + cols).astype(jnp.uint32)
            keep = _keep_mask(gidx, seed_ref[0].astype(jnp.uint32), dropout_prob)
            scale = jnp.float32(1.0 / (1.0 - dropout_prob))
            # select then one scaled mul; no zeros_like materialization.
            y = jnp.where(keep, y, 0.0) * scale

    o_ref[...] = y.astype(o_ref.dtype)


def _choose_lane_width(S: int, D: int, max_lanes: int = 2048) -> int:
    """Pick a lane-dense last-dim width C (multiple of 128) with C | S*D when possible."""
    n = S * D
    if D % 128 == 0:
        return D
    if n % 128 == 0:
        c = 128
        while c * 2 <= max_lanes and n % (c * 2) == 0:
            c *= 2
        return c
    return D  # fallback: sub-128 lanes -> masked stores (correct, just slower)


def _choose_row_tile(R: int, C: int, itemsize: int,
                     vmem_budget_bytes: int = 16 * 1024 * 1024,
                     max_rows: int = 512) -> int:
    """Row-tile size: multiple of 8 (or full axis), sized so that
    3 operands x 2 pipeline buffers of (tR, C) fit comfortably in scoped VMEM
    (safe for v7x's 64 MiB physical / 32 MiB scoped default)."""
    cap = vmem_budget_bytes // (6 * C * itemsize)
    cap = max(8, min(max_rows, (cap // 8) * 8))
    if R <= cap:
        return R
    t = cap
    while t >= 8:
        if R % t == 0:
            return t
        t -= 8
    return R  # no 8-aligned divisor; fall back to full axis (correct, may be large)


def positional_encoding_forward(x: jnp.ndarray,
                                pe_table: jnp.ndarray,
                                dropout_prob: float,
                                seed: int = 0,
                                training: bool = False) -> jnp.ndarray:
    """x: [B, S, D]. Returns dropout(x + pe[:, :S]), matching the PyTorch module."""
    B, S, D = x.shape
    N = S * D

    # Lane-dense layout: [B, R, C] with C a multiple of 128 when possible.
    C = _choose_lane_width(S, D)
    R = N // C
    tR = _choose_row_tile(R, C, jnp.dtype(x.dtype).itemsize)
    n_row_tiles = R // tR

    x_in = x.reshape(B, R, C)

    # PE: reuse the full registered buffer (no HBM slice copy) when the row
    # tiling is compatible; otherwise slice+reshape to [1, R, C].
    max_len = pe_table.shape[1]
    full_rows = (max_len * D) // C if (max_len * D) % C == 0 else 0
    if full_rows >= R and (tR % 8 == 0 or full_rows == R):
        pe_in = pe_table.reshape(1, full_rows, C)
    else:
        pe_in = pe_table[:, :S, :].reshape(1, R, C)
    if pe_in.dtype != x.dtype:
        pe_in = pe_in.astype(x.dtype)  # halves PE HBM traffic for bf16 activations

    seed_arr = jnp.array([seed], dtype=jnp.int32)

    kernel = functools.partial(
        _pos_enc_kernel,
        dropout_prob=float(dropout_prob),
        training=bool(training),
        n_per_batch=N,
        lanes=C,
        row_tile=tR,
    )

    out = pl.pallas_call(
        kernel,
        out_shape=jax.ShapeDtypeStruct((B, R, C), x.dtype),
        grid_spec=pltpu.PrefetchScalarGridSpec(
            num_scalar_prefetch=1,
            # Batch innermost: the PE block index is constant across consecutive
            # steps, so Pallas skips its re-DMA (PE fetched once per row tile).
            grid=(n_row_tiles, B),
            in_specs=[
                pl.BlockSpec((1, tR, C), lambda s, b, seed: (b, s, 0)),  # x tile
                pl.BlockSpec((1, tR, C), lambda s, b, seed: (0, s, 0)),  # shared PE tile
            ],
            out_specs=pl.BlockSpec((1, tR, C), lambda s, b, seed: (b, s, 0)),
        ),
        compiler_params=pltpu.CompilerParams(
            # All iterations are independent (stateless dropout hash) -> both
            # axes parallel; lets v7x's 2 TensorCores split the grid.
            dimension_semantics=("parallel", "parallel")),
    )(seed_arr, x_in, pe_in)

    return out.reshape(B, S, D)


if __name__ == "__main__":
    batch_size = 2
    seq_len = 8
    d_model = 32
    dropout_prob = 0.1

    key = jax.random.PRNGKey(0)
    x = jax.random.normal(key, (batch_size, seq_len, d_model), dtype=jnp.float32)

    pe_table = build_positional_encoding(d_model, MAX_INPUT_SEQUENCE_LENGTH)

    # Eval path (module.eval(): dropout is identity).
    out_eval = positional_encoding_forward(x, pe_table, dropout_prob, seed=0, training=False)
    out_eval = jax.block_until_ready(out_eval)
    ref_eval = x + pe_table[:, :seq_len, :]
    assert jnp.allclose(out_eval, ref_eval, atol=1e-6), "mismatch vs reference add (eval)"

    # Training path (dropout active inside the kernel). The mask is a deterministic
    # function of (seed, global element index), so we can check it exactly.
    seed = 123
    out_train = positional_encoding_forward(x, pe_table, dropout_prob, seed=seed, training=True)
    out_train = jax.block_until_ready(out_train)
    assert out_train.shape == x.shape
    gidx = jnp.arange(batch_size * seq_len * d_model, dtype=jnp.uint32).reshape(x.shape)
    keep = _keep_mask(gidx, jnp.uint32(seed), dropout_prob)
    ref_train = jnp.where(keep, ref_eval, 0.0) * jnp.float32(1.0 / (1.0 - dropout_prob))
    assert jnp.allclose(out_train, ref_train, atol=1e-5), "mismatch vs reference dropout (train)"

    print("KERNEL_OK")
</pallas_src>

<mosaic_0001>
module attributes {stable_mosaic.version = 11 : i64} {
  func.func @_pos_enc_kernel(%arg0: i32, %arg1: i32, %arg2: memref<1xi32, #tpu.memory_space<smem>>, %arg3: memref<1x1x256xf32, #tpu.memory_space<vmem>>, %arg4: memref<1x1x256xf32, #tpu.memory_space<vmem>>, %arg5: memref<1x1x256xf32, #tpu.memory_space<vmem>>) attributes {dimension_semantics = [#tpu.dimension_semantics<parallel>, #tpu.dimension_semantics<parallel>], iteration_bounds = array<i64: 1, 2>, scalar_prefetch = 1 : i64, scratch_operands = 0 : i64, tpu.core_type = #tpu.core_type<tc>, window_params = [{transform_indices = @transform_0, window_bounds = array<i64: 1, 1, 256>}, {transform_indices = @transform_1, window_bounds = array<i64: 1, 1, 256>}, {transform_indices = @transform_2, window_bounds = array<i64: 1, 1, 256>}]} {
    %c0 = arith.constant 0 : index
    %c0_0 = arith.constant 0 : index
    %c0_1 = arith.constant 0 : index
    %0 = vector.load %arg3[%c0, %c0_0, %c0_1] : memref<1x1x256xf32, #tpu.memory_space<vmem>>, vector<1x1x256xf32>
    %c0_2 = arith.constant 0 : index
    %c0_3 = arith.constant 0 : index
    %c0_4 = arith.constant 0 : index
    %1 = vector.load %arg4[%c0_2, %c0_3, %c0_4] : memref<1x1x256xf32, #tpu.memory_space<vmem>>, vector<1x1x256xf32>
    %2 = arith.addf %0, %1 : vector<1x1x256xf32>
    %c0_5 = arith.constant 0 : index
    %c0_6 = arith.constant 0 : index
    %c0_7 = arith.constant 0 : index
    %3 = vector.load %arg5[%c0_5, %c0_6, %c0_7] : memref<1x1x256xf32, #tpu.memory_space<vmem>>, vector<1x1x256xf32>
    tpu.vector_store %arg5[%c0_5, %c0_6, %c0_7], %2 {strides = array<i32>} : memref<1x1x256xf32, #tpu.memory_space<vmem>>, vector<1x1x256xf32>,
    return
  }
  func.func @transform_0(%arg0: i32, %arg1: i32, %arg2: memref<1xi32, #tpu.memory_space<smem>>) -> (i32, i32, i32) {
    %c0_i32 = arith.constant 0 : i32
    %c0_i32_0 = arith.constant 0 : i32
    return %arg1, %arg0, %c0_i32 : i32, i32, i32
  }
  func.func @transform_1(%arg0: i32, %arg1: i32, %arg2: memref<1xi32, #tpu.memory_space<smem>>) -> (i32, i32, i32) {
    %c0_i32 = arith.constant 0 : i32
    %c0_i32_0 = arith.constant 0 : i32
    %c0_i32_1 = arith.constant 0 : i32
    return %c0_i32, %arg0, %c0_i32_0 : i32, i32, i32
  }
  func.func @transform_2(%arg0: i32, %arg1: i32, %arg2: memref<1xi32, #tpu.memory_space<smem>>) -> (i32, i32, i32) {
    %c0_i32 = arith.constant 0 : i32
    %c0_i32_0 = arith.constant 0 : i32
    return %arg1, %arg0, %c0_i32 : i32, i32, i32
  }
}

</mosaic_0001>

<bundles_post_ra>
// kernel: tpu_custom_call.1
= control target key start
LH: loop header
LB: loop body
LE: loop exit
PB: predicated region body
PF: predicated region fallthrough
CT: control target
= control target key end

     0   :  { %9 = vsyncpa [#allocation5], 0  ;;  %s670_s0 = inlined_call_operand.<no memory space> [shape: s32[1], index: 0, kind: input, shape index: {}]   ;;  %s671_s1 = inlined_call_operand.hbm [shape: f32[2,1,256], index: 1, kind: input, shape index: {}]   ;;  %s672_s2 = inlined_call_operand.vmem [shape: f32[1,1,256], index: 2, kind: input, shape index: {}]   ;;  %s673_s3 = inlined_call_operand.hbm [shape: f32[2,1,256], index: 3, kind: output, shape index: {}]  }
   0x1   :  { %11 = vsyncpa [#allocation5 + $0x1], 0 }
   0x2   :  { %12 = vsyncpa [#allocation6], 0 }
   0x3   :  { %14 = vsyncpa [#allocation6 + $0x1], 0  ;;  %s533_s12 = smov 0   ;;  %s535_s13 = smov 0  }
   0x4   :  { %s537_s14 = smov 0   ;;  %s539_s0 = smov 0  }
   0x5   :  { %s541_s15 = smov 0   ;;  %s543_s16 = smov 0  }
   0x6 LB: > { %s321_s17 = sadd.s32 4294967295, %s509_s16   ;;  %s322_s18 = sadd.s32 4294967294, %s509_s16   ;;  %s509_s16 = sphi %s543_s16, %s20_s16   ;;  %s505_s15 = sphi %s541_s15, %s685_s15   ;;  %s501_s0 = sphi %s539_s0, %s684_s0   ;;  %s497_s14 = sphi %s537_s14, %s683_s14   ;;  %s493_s13 = sphi %s535_s13, %s682_s13   ;;  %s489_s12 = sphi %s533_s12, %s681_s12  }
   0x7   : > { %s29_s19 = sadd.s32 1, %s505_s15  ;;  %s41_s20 = sadd.s32 1, %s497_s14 }
   0x8   : > { %p30_p0 = scmp.ge.s32.totalorder %s29_s19, 2  ;;  %p48_p1 = scmp.ne.s32.totalorder %s497_s14, %s493_s13 }
   0x9   : > { %p49_p2 = scmp.eq.s32.totalorder %s509_s16, 0  ;;  %p54_p3 = scmp.ne.s32.totalorder %s493_s13, %s489_s12 }
   0xa   : > { %s687_s19 = smov (%p30_p0, %s29_s19), 0  ;;  %p55_p5 = scmp.eq.s32.totalorder %s321_s17, 0 }
   0xb   : > { %p574_p4 = por %p49_p2, %p48_p1  ;;  %s36_s22 = ssub.s32 %s505_s15, %s687_s19 }
   0xc   : > { %p106_p6 = scmp.eq.s32.totalorder %s321_s17, 1  ;;  %p39_p7 = scmp.eq.s32.totalorder %s36_s22, 0 }
   0xd   : > { %p580_p8 = por %p55_p5, %p54_p3  ;;  %p112_p10 = scmp.eq.s32.totalorder %s322_s18, 1 }
   0xe   : > { %p584_p9 = por %p106_p6, %p48_p1  ;;  %p351_p13 = scmp.lt.s32.totalorder %s509_s16, 2 }
   0xf   : > { %s589_s25 = scalar_select %p39_p7, %s497_s14, %s41_s20  }
  0x10   : > { %p591_p11 = por %p112_p10, %p54_p3  ;;  %s139_s27 = sand.u32 1, %s497_s14  }
  0x11   : > { %s326_s28 = sshll.u32 %s139_s27, 1  ;;  %s337_s29 = sshll.u32 %s505_s15, 5 }
  0x12   : > { %s677_s26 = scalar_select %p591_p11, 1, 0 }
  0x13   : > { %s151_s5 = scalar_lea.hbm %s671_s1, %s337_s29  ;;  %s143_s6 = scalar_lea.vmem [#allocation4], %s326_s28 }
  0x14   : > { %s153_s7 = sshll.u32 %s143_s6, 4  ;;  %p604_p0 = pnand %p351_p13, %p574_p4  ;;  %s154_s7 = int_to_ptr.vmem [resolvable:$true] %s153_s7 }
  0x15   : > { %p329_p1 = scmp.ge.s32.totalorder %s509_s16, 1  ;;  %p158_p2 = scmp.lt.s32.totalorder %s509_s16, 3 }
  0x16   : > { %s140_s9 = scalar_lea.sflag [#allocation5], %s139_s27  ;;  %p403_p3 = pneg %p604_p0 }
  0x17   : > { %s414_s10 = scalar_lea.vmem %s154_s7, 32  ;;  %s511_s11 = smov [#allocation4]  }
  0x18   : > { %p415_p5 = scmp.ne.s32.totalorder %s154_s7, %s414_s10  ;;  %s419_s17 = sshll.u32 %s511_s11, 4  ;;  %s420_s17 = int_to_ptr.vmem [resolvable:$false] %s419_s17 }
  0x19   : > { %s421_s18 = scalar_lea.vmem %s420_s17, 64  ;;  %p422_p10 = scmp.lt.s32.totalorder %s154_s7, %s420_s17 }
  0x1a   : > { %p417_p6 = pnand %p415_p5, %p403_p3  ;;  %p423_p12 = scmp.lt.s32.totalorder %s421_s18, %s414_s10 }
  0x1c   : > { %p418_p7 = pneg %p417_p6  ;;  %p424_p4 = por %p423_p12, %p422_p10 }
  0x1e   : > { %p425_p13 = pnand %p424_p4, %p418_p7 }
  0x20   : > { %428 = shalt.err (!%p425_p13)
}
  0x21   : > { %346 = dma.hbm_to_vmem [thread:$0]  (!%p604_p0), %s151_s5, 32, %s154_s7, %s140_s9  }
  0x22   : > { %p159_p11 = pnand %p329_p1, %p158_p2 }
  0x23   : > { %s619_s20 = sand.u32 (!%p159_p11), 1, %s493_s13  }
  0x24   : > { %162 = sbr.rel (%p159_p11) target bundleno = 66 (0x42), region = 28  ;;  %s330_s21 = sshll.u32 (!%p159_p11), %s619_s20, 1 }
  0x25   : > { %s165_s22 = scalar_lea.sflag (!%p159_p11), [#allocation5], %s619_s20  ;;  %s168_s27 = scalar_lea.vmem (!%p159_p11), [#allocation4], %s330_s21 }
  0x29   : > { %480 = dma.done.wait (%p580_p8), %s165_s22, 32  }
  0x2a   : > { %482 = vsyncadd (%p580_p8), %s165_s22, 4294967264  ;;  %v200_v0 = vlaneseq  ;;  %s192_s28 = scalar_lea.vmem [#allocation7], %s330_s21  ;;  %s338_s30 = sshll.u32 %s501_s0, 5  ;;  %v197_v1 = vld [vmem:[%s168_s27] sm:$0x3] }
  0x2b   : > { %s222_s29 = sshll.u32 %s192_s28, 4  ;;  %v198_v2 = vld [vmem:[%s672_s2] sm:$0x3]  ;;  %s220_s23 = scalar_lea.hbm %s673_s3, %s338_s30  ;;  %s223_s29 = int_to_ptr.vmem [resolvable:$true] %s222_s29 }
  0x2c   : > { %vm202_vm0 = vcmp.lt.s32.totalorder %v200_v0, 256  ;;  %v199_v3 = vadd.f32 %v198_v2, %v197_v1  ;;  %s206_s8 = scalar_lea.sflag [#allocation6], %s619_s20  ;;  %s429_s9 = scalar_lea.vmem %s223_s29, 32 }
  0x2d   : > { %p430_p8 = scmp.ne.s32.totalorder %s223_s29, %s429_s9  ;;  %s512_s0 = smov [#allocation7]  }
  0x2e   : > { %204 = vst.msk [vmem:[%s192_s28] sm:$0x3] %vm202_vm0, %v199_v3  ;;  %s433_s10 = sshll.u32 %s512_s0, 4  ;;  %s434_s10 = int_to_ptr.vmem [resolvable:$false] %s433_s10 }
  0x2f   : > { %p431_p11 = pnand %p430_p8, %p584_p9  ;;  %s435_s11 = scalar_lea.vmem %s434_s10, 64 }
  0x30   : > { %p436_p0 = scmp.lt.s32.totalorder %s223_s29, %s434_s10  ;;  %p437_p1 = scmp.lt.s32.totalorder %s435_s11, %s429_s9 }
  0x31   : > { %p432_p12 = pneg %p431_p11 }
  0x32   : > { %p438_p2 = por %p437_p1, %p436_p0 }
  0x34   : > { %p439_p3 = pnand %p438_p2, %p432_p12 }
  0x36   : > { %442 = shalt.err (!%p439_p3)
}
  0x37   : > { %s443_s17 = scalar_lea.hbm %s220_s23, 32  ;;  %s447_s21 = scalar_lea.hbm %s673_s3, 64 }
  0x38   : > { %p444_p5 = scmp.ne.s32.totalorder %s220_s23, %s443_s17  ;;  %p448_p10 = scmp.lt.s32.totalorder %s220_s23, %s673_s3 }
  0x39   : > { %p449_p4 = scmp.lt.s32.totalorder %s447_s21, %s443_s17 }
  0x3a   : > { %p445_p6 = pnand %p444_p5, %p584_p9 }
  0x3b   : > { %p450_p13 = por %p449_p4, %p448_p10 }
  0x3c   : > { %p446_p7 = pneg %p445_p6 }
  0x3e   : > { %p451_p8 = pnand %p450_p13, %p446_p7 }
  0x40   : > { %454 = shalt.err (!%p451_p8)
}
  0x41   : > { %341 = dma.vmem_to_hbm [thread:$0]  (%p584_p9), %s223_s29, 32, %s220_s23, %s206_s8  }
  0x42 PF: > { %s234_s28 = sand.u32 1, %s489_s12   ;;  %p679_p11 = scmp.ne.s32.totalorder %s677_s26, 0 }
  0x43   : > { %p680_p12 = scmp.ge.s32.totalorder %s509_s16, 2  ;;  %s235_s30 = scalar_lea.sflag [#allocation6], %s234_s28 }
  0x45   : > { %p348_p0 = pnand %p680_p12, %p679_p11 }
  0x47   : > { %p349_p1 = pneg %p348_p0 }
  0x49   : > { %484 = dma.done.wait (%p349_p1), %s235_s30, 32  }
  0x4a   : > { %486 = vsyncadd (%p349_p1), %s235_s30, 4294967264  ;;  %s20_s16 = sadd.s32 1, %s509_s16   ;;  %s681_s12 = smov %s493_s13 }
  0x4b   : > { %p17_p2 = scmp.ge.s32.totalorder %s20_s16, 4   ;;  %s682_s13 = smov %s497_s14 }
  0x4c   : > { %s683_s14 = smov %s589_s25  ;;  %s684_s0 = smov %s505_s15 }
  0x4d   : > { %s685_s15 = smov %s687_s19  ;;  %19 = sbr.rel (!%p17_p2) target bundleno = 6 (0x6), region = 76 }
  0x52   :  { %240 = vsyncpa [#allocation5], 1 }
  0x53   :  { %242 = vsyncpa [#allocation5 + $0x1], 1 }
  0x54   :  { %243 = vsyncpa [#allocation6], 1 }
  0x55   :  { %245 = vsyncpa [#allocation6 + $0x1], 1 }

</bundles_post_ra>
